<compile_context>
chip_gen: v5e
topology: v5e:2x2
jax: 0.10.0
libtpu: 0.0.40
codegen_flags: <defaults>
</compile_context>

<pallas_src>
import functools
import math

import jax
import jax.numpy as jnp
import numpy as np
from jax import lax
from jax.experimental import pallas as pl
from jax.experimental.pallas import tpu as pltpu

_R_EARTH = 6371000.0
_DEG2RAD = math.pi / 180.0
_NUM_CORE_SPLITS = 2          # leading "parallel" grid axis (both TCs on v7x)


@functools.lru_cache(maxsize=None)
def _roll_plus_one_is_next_lane() -> bool:
    """True iff pltpu.roll(x, shift=1, axis=-1)[..., l] == x[..., l+1].

    Resolved ONCE per process with a tiny probe kernel; the hot kernel then
    emits exactly one roll with a static shift (no per-tile direction probe).
    """
    def probe(x_ref, o_ref):
        o_ref[...] = pltpu.roll(x_ref[...], shift=1, axis=1)

    x = jnp.broadcast_to(lax.iota(jnp.float32, 128), (8, 128))
    y = pl.pallas_call(probe, out_shape=jax.ShapeDtypeStruct((8, 128), jnp.float32))(x)
    return bool(jax.device_get(y[0, 0]) == 1.0)


def _roll_shift_for_next_lane(width: int) -> int:
    """Static shift s such that roll(x, s, axis=-1)[..., l] == x[..., l+1]."""
    return 1 if _roll_plus_one_is_next_lane() else width - 1


def _custom_loss_kernel(p_ref, t_ref, out_ref, acc_ref, *,
                        tm, tw, bpc, n_rows, n_valid_lanes, pair_shift,
                        mse_scale, hav_scale):
    """One (tm, tw) tile of the interleaved [lat,lon,lat,lon,...] rows.

    Accumulates   mse_scale * (pred - true)^2          on every valid lane
                + hav_scale * central_angle(point)     on even (lat) lanes
    into an (8, tw) f32 accumulator; the last grid step of each core split
    reduces the accumulator to that core's scalar partial loss.
    """
    c = pl.program_id(0)          # core split (parallel)
    i = pl.program_id(1)          # row block within this core's share
    j = pl.program_id(2)          # lane block

    @pl.when(jnp.logical_and(i == 0, j == 0))
    def _init():
        acc_ref[...] = jnp.zeros_like(acc_ref)

    p = p_ref[...].astype(jnp.float32)          # (tm, tw) degrees, interleaved
    t = t_ref[...].astype(jnp.float32)

    lane = lax.broadcasted_iota(jnp.int32, (tm, tw), 1)
    row = lax.broadcasted_iota(jnp.int32, (tm, tw), 0)
    is_even_lane = (lane & 1) == 0                       # lat lane of each point
    global_row = row + (c * bpc + i) * tm
    global_lane = lane + j * tw
    # Masks ragged row/lane blocks AND the clamped duplicate blocks of the
    # core split (their logical rows are >= n_rows).  Masking happens BEFORE
    # any summation, so unspecified out-of-bounds data (even NaN/Inf) is inert.
    valid = (global_row < n_rows) & (global_lane < n_valid_lanes)

    # ---- MSE term (elementwise, interleaving irrelevant) ----
    d = p - t                                            # degrees
    sq = d * d

    # ---- Haversine term ----
    # sin(delta/2): even lanes -> sin(dlat/2), odd lanes -> sin(dlon/2).
    sh = jnp.sin(d * (0.5 * _DEG2RAD))                   # sign irrelevant (squared)
    sh2 = sh * sh
    # cos(plat)*cos(tlat) = 0.5*(1 - 2*sin^2(dlat/2) + cos(plat + tlat))
    # -> one cos per point instead of two (EUP is the post-memory bottleneck).
    cs = jnp.cos((p + t) * _DEG2RAD)                     # even lanes: cos(plat+tlat)
    cc = 0.5 * (1.0 - 2.0 * sh2 + cs)                    # even lanes: cos*cos
    # ONE statically-shifted XLU roll brings each point's sin^2(dlon/2) (odd
    # lane) next to its sin^2(dlat/2) (even lane).
    sh2_pair = pltpu.roll(sh2, shift=pair_shift, axis=1)

    a = jnp.clip(sh2 + cc * sh2_pair, 0.0, 1.0)          # valid on even lanes
    # 2*atan2(sqrt(a), sqrt(1-a)) == 2*atan(sqrt(a)*rsqrt(1-a)) for a in [0,1];
    # flooring 1-a keeps antipodal points finite (atan(huge) -> pi/2).
    ang = 2.0 * jnp.arctan(jnp.sqrt(a) * lax.rsqrt(jnp.maximum(1.0 - a, 1e-30)))

    hav_term = jnp.where(is_even_lane, hav_scale * ang, 0.0)
    contrib = jnp.where(valid, mse_scale * sq + hav_term, 0.0)

    # Reduce over sublane groups with pure VPU adds; accumulate into (8, tw).
    if tm % 8 == 0:
        acc_ref[...] += jnp.sum(contrib.reshape(tm // 8, 8, tw), axis=0)
    else:
        # Only reachable for the tiny single-block case tm == batch < 8.
        acc_ref[0:tm, :] += contrib

    @pl.when(jnp.logical_and(i == pl.num_programs(1) - 1,
                             j == pl.num_programs(2) - 1))
    def _finalize():
        out_ref[...] = jnp.sum(acc_ref[...]).reshape(1, 1, 1)


def _round_up(x, m):
    return ((x + m - 1) // m) * m


def _sublane_multiple(dtype) -> int:
    # Packed sublane tiling: 8 rows for 4-byte dtypes, 16 for 2-byte, 32 for 1-byte.
    return max(8, 32 // max(jnp.dtype(dtype).itemsize, 1))


def custom_loss(y_pred, y_true, mse_weight=1.0, haversine_weight=1.0,
                block_rows=None, block_lanes=None,
                target_block_bytes=4 << 20, max_block_lanes=2048):
    """Equivalent of CustomLoss(mse_weight, haversine_weight, 'mean')(y_pred, y_true)."""
    assert y_pred.shape == y_true.shape and y_pred.ndim == 3 and y_pred.shape[-1] == 2
    assert y_pred.dtype == y_true.dtype
    b, s, _ = y_pred.shape
    w_valid = 2 * s

    # Free reshape: (B, S, 2) -> (B, 2S); lat/lon stay interleaved along lanes,
    # so the data makes exactly one HBM pass (no de-interleave copies).
    p2 = y_pred.reshape(b, w_valid)
    t2 = y_true.reshape(b, w_valid)

    w = w_valid
    if w < 128:
        # TODO(synk): this pad is one extra HBM copy, but it is only ever hit
        # for S < 64 (a handful of lanes per row).
        pad = 128 - w
        p2 = jnp.pad(p2, ((0, 0), (0, pad)))
        t2 = jnp.pad(t2, ((0, 0), (0, pad)))
        w = 128

    itemsize = jnp.dtype(p2.dtype).itemsize
    sub_mult = _sublane_multiple(p2.dtype)

    # ---- lane tiling (only kicks in for very long rows / B-small S-huge) ----
    if block_lanes is None:
        tw = w if w <= max_block_lanes else max_block_lanes
    else:
        tw = min(int(block_lanes), w)
    if tw < w:
        tw = max(128, (tw // 128) * 128)          # tiled lane dim must be /128
    n_lane_blocks = pl.cdiv(w, tw)

    # ---- row tiling: ~target_block_bytes per input block, packed-tile aligned ----
    if b < 8:
        tm = b                                    # full (tiny) batch in one block
    else:
        if block_rows is None:
            tm = max(1, int(target_block_bytes) // max(tw * itemsize, 1))
        else:
            tm = int(block_rows)
        tm = max(sub_mult, (tm // sub_mult) * sub_mult)
        tm = min(tm, _round_up(b, sub_mult))

    n_row_blocks = pl.cdiv(b, tm)
    bpc = pl.cdiv(n_row_blocks, _NUM_CORE_SPLITS)   # row blocks per core split
    grid = (_NUM_CORE_SPLITS, bpc, n_lane_blocks)

    pair_shift = _roll_shift_for_next_lane(tw)

    n_points = float(b * s)
    kernel = functools.partial(
        _custom_loss_kernel,
        tm=tm, tw=tw, bpc=bpc, n_rows=b, n_valid_lanes=w_valid,
        pair_shift=pair_shift,
        mse_scale=float(mse_weight) / (2.0 * n_points),
        hav_scale=float(haversine_weight) * _R_EARTH / (1000.0 * n_points),
    )

    def in_map(c, i, j):
        # Clamp so the (possibly duplicated) last row block of each core split
        # stays in bounds; the duplicates' rows are masked to zero in-kernel.
        return (jnp.minimum(c * bpc + i, n_row_blocks - 1), j)

    # 2 inputs x 2 pipeline buffers + tiny (8, tw) accumulator.
    block_bytes = tm * tw * itemsize
    vmem_needed = 2 * 2 * block_bytes + 8 * tw * 4 + (1 << 20)
    vmem_limit = int(1.25 * vmem_needed) if vmem_needed > (12 << 20) else None

    out = pl.pallas_call(
        kernel,
        out_shape=jax.ShapeDtypeStruct((_NUM_CORE_SPLITS, 1, 1), jnp.float32),
        grid_spec=pltpu.PrefetchScalarGridSpec(
            num_scalar_prefetch=0,
            grid=grid,
            in_specs=[pl.BlockSpec((tm, tw), in_map),
                      pl.BlockSpec((tm, tw), in_map)],
            out_specs=pl.BlockSpec((1, 1, 1), lambda c, i, j: (c, 0, 0)),
            scratch_shapes=[pltpu.VMEM((8, tw), jnp.float32)],
        ),
        compiler_params=pltpu.CompilerParams(
            dimension_semantics=("parallel", "arbitrary", "arbitrary"),
            vmem_limit_bytes=vmem_limit,
        ),
        cost_estimate=pl.CostEstimate(
            flops=int(30 * n_points),
            transcendentals=int(7 * n_points),
            bytes_accessed=int(2 * b * w_valid * itemsize + 8),
        ),
    )(p2, t2)
    # Sum the per-core-split partials (2 adds) in the wrapper.
    return jnp.sum(out)


def _reference_loss(y_pred, y_true, mse_weight=1.0, haversine_weight=1.0):
    """Pure-JAX reference mirroring the PyTorch combined_loss with reduction='mean'."""
    y_pred = y_pred.astype(jnp.float32)
    y_true = y_true.astype(jnp.float32)
    mse = jnp.mean((y_pred - y_true) ** 2)
    plr = jnp.deg2rad(y_pred[..., 0])
    plo = jnp.deg2rad(y_pred[..., 1])
    tlr = jnp.deg2rad(y_true[..., 0])
    tlo = jnp.deg2rad(y_true[..., 1])
    dlat = tlr - plr
    dlon = tlo - plo
    a = jnp.sin(dlat / 2) ** 2 + jnp.cos(plr) * jnp.cos(tlr) * jnp.sin(dlon / 2) ** 2
    c = 2 * jnp.arctan2(jnp.sqrt(a), jnp.sqrt(1 - a))
    hav = jnp.mean(_R_EARTH * c) / 1000.0
    return mse_weight * mse + haversine_weight * hav


if __name__ == "__main__":
    key = jax.random.PRNGKey(0)

    def make_inputs(k, batch, seq, dtype=jnp.float32):
        k_true, k_noise = jax.random.split(k)
        lat = jax.random.uniform(k_true, (batch, seq, 1), minval=-60.0, maxval=60.0)
        lon = jax.random.uniform(jax.random.fold_in(k_true, 1), (batch, seq, 1),
                                 minval=-120.0, maxval=120.0)
        y_true = jnp.concatenate([lat, lon], axis=-1)
        y_pred = y_true + 0.5 * jax.random.normal(k_noise, y_true.shape)
        return y_pred.astype(dtype), y_true.astype(dtype)

    def check(y_pred, y_true, mw, hw, **kw):
        got = jax.block_until_ready(custom_loss(y_pred, y_true, mw, hw, **kw))
        ref = _reference_loss(y_pred, y_true, mw, hw)
        np.testing.assert_allclose(np.asarray(got), np.asarray(ref),
                                   rtol=1e-3, atol=1e-3)

    # 1) Module-spec shape (batch=2, seq=8): lane-padded, single tiny row block.
    check(*make_inputs(key, 2, 8), 1.0, 1.0)
    # 2) Ragged row blocks + core-split clamping (3 row blocks over 2 splits).
    check(*make_inputs(jax.random.fold_in(key, 1), 20, 128), 0.5, 2.0, block_rows=8)
    # 3) Lane tiling for long sequences (4 lane blocks of 1024).
    check(*make_inputs(jax.random.fold_in(key, 2), 4, 2048), 1.0, 1.0, block_lanes=1024)
    # 4) Ragged last lane block (600 lanes over 256-lane tiles).
    check(*make_inputs(jax.random.fold_in(key, 3), 6, 300), 2.0, 0.25, block_lanes=256)
    # 5) bf16 inputs: packed (16, 128) row-tiling path.
    check(*make_inputs(jax.random.fold_in(key, 4), 32, 64, dtype=jnp.bfloat16), 1.0, 1.0)

    print("KERNEL_OK")
</pallas_src>

<mosaic_0001>
module attributes {stable_mosaic.version = 11 : i64} {
  func.func @probe(%arg0: memref<8x128xf32, #tpu.memory_space<vmem>>, %arg1: memref<8x128xf32, #tpu.memory_space<vmem>>) attributes {dimension_semantics = [], scalar_prefetch = 0 : i64, scratch_operands = 0 : i64, tpu.core_type = #tpu.core_type<tc>} {
    %c0 = arith.constant 0 : index
    %c0_0 = arith.constant 0 : index
    %0 = vector.load %arg0[%c0, %c0_0] : memref<8x128xf32, #tpu.memory_space<vmem>>, vector<8x128xf32>
    %c1_i32 = arith.constant 1 : i32
    %1 = tpu.dynamic_rotate %0 by %c1_i32 dim 1 : vector<8x128xf32>, i32 -> vector<8x128xf32>
    %c0_1 = arith.constant 0 : index
    %c0_2 = arith.constant 0 : index
    %2 = vector.load %arg1[%c0_1, %c0_2] : memref<8x128xf32, #tpu.memory_space<vmem>>, vector<8x128xf32>
    tpu.vector_store %arg1[%c0_1, %c0_2], %1 {strides = array<i32>} : memref<8x128xf32, #tpu.memory_space<vmem>>, vector<8x128xf32>,
    return
  }
}

</mosaic_0001>

<bundles_post_ra>
// kernel: tpu_custom_call.1
= control target key start
LH: loop header
LB: loop body
LE: loop exit
PB: predicated region body
PF: predicated region fallthrough
CT: control target
= control target key end

     0   :  { %6 = vsyncpa [#allocation3], 0  ;;  %s118_s0 = inlined_call_operand.hbm [shape: f32[8,128], index: 0, kind: input, shape index: {}]   ;;  %s119_s1 = inlined_call_operand.hbm [shape: f32[8,128], index: 1, kind: output, shape index: {}]  }
   0x1   :  { %7 = vsyncpa [#allocation4], 0  ;;  %s13_s8 = sshll.u32 %s118_s0, 4  ;;  %s99_s9 = smov [#allocation2]   ;;  %s14_s8 = int_to_ptr.hbm [resolvable:$true] %s13_s8 }
   0x2   :  { %s15_s10 = sshll.u32 %s99_s9, 4  ;;  %s16_s10 = int_to_ptr.vmem [resolvable:$true] %s15_s10 }
   0x3   :  { %18 = dma.hbm_to_vmem [thread:$0]  %s14_s8, 128, %s16_s10, [#allocation3]  }
   0x4   :  { %95 = dma.done.wait [#allocation3], 128  }
   0x5   :  { %96 = vsyncadd [#allocation3], 4294967168  ;;  %v23_v0 = vld [vmem:[#allocation2] sm:$0xff]  ;;  %s100_s11 = smov 1   ;;  %s101_s12 = smov [#allocation5]  }
   0x6   :  { %24 = vrot.lane.b32.xlu0 %v23_v0, %s100_s11  ;;  %s32_s13 = sshll.u32 %s101_s12, 4  ;;  %s34_s16 = sshll.u32 %s119_s1, 4  ;;  %s33_s13 = int_to_ptr.vmem [resolvable:$true] %s32_s13  ;;  %s35_s16 = int_to_ptr.hbm [resolvable:$true] %s34_s16 }
  0x78   :  { %v25_v1 = vpop.permute.xlu0 %24 }
  0x79   :  { %26 = vst [vmem:[#allocation5] sm:$0xff] %v25_v1 }
  0x7a   :  { %37 = dma.vmem_to_hbm [thread:$0]  %s33_s13, 128, %s35_s16, [#allocation4]  }
  0x7b   :  { %97 = dma.done.wait [#allocation4], 128  }
  0x7c   :  { %98 = vsyncadd [#allocation4], 4294967168 }
  0x7d   :  { %42 = vsyncpa [#allocation3], 1 }
  0x7e   :  { %43 = vsyncpa [#allocation4], 1 }

</bundles_post_ra>
